<compile_context>
chip_gen: v7x
topology: tpu7x:2x2x1
jax: 0.10.0
libtpu: 0.0.40
codegen_flags: <defaults>
</compile_context>

<pallas_src>
import math
import jax
import jax.numpy as jnp
from jax.experimental import pallas as pl
from jax.experimental.pallas import tpu as pltpu


VMEM_LIMIT = 40 * 1024 * 1024   # > v5e's 16 MiB scoped default, < v7x's 64 MiB physical


def _round_up(a, b):
    return (a + b - 1) // b * b


def _pick_row_tile(n, target=1024, align=16):
    """Row tile: big (amortize ~0.35us/step, >=85% HBM roofline at >=512) but keep >=2 grid steps
    so v7x megacore has work for both TensorCores. Multiple of 16 (bf16 sublane pack)."""
    if n <= 2 * align:
        return n                                   # one small block (block == full dim is legal)
    half = _round_up((n + 1) // 2, align)          # ensures grid >= 2
    t = min(target, half)
    return max(align, (t // align) * align)


def _pick_k_tile(f):
    """K tile for the linear reduction: must divide F exactly (OOB reads in a reduction would
    corrupt the accumulator). Falls back to full F (single K step)."""
    if f <= 1024:
        return f
    for tk in (1024, 512, 256, 128):
        if f % tk == 0:
            return tk
    return f


# ----------------------------- Pallas kernels ------------------------------

def _linear_kernel(x_ref, wt_ref, b_ref, o_ref, acc_ref):
    # o = x @ W^T + b, K-tiled: acc is a resident f32 VMEM scratch across the K grid axis.
    k = pl.program_id(1)

    @pl.when(k == 0)
    def _():
        acc_ref[...] = jnp.zeros_like(acc_ref)

    acc_ref[...] += jnp.dot(
        x_ref[...].astype(jnp.bfloat16),          # bf16 operands, f32 accumulation (native MXU)
        wt_ref[...],
        preferred_element_type=jnp.float32,
    )

    @pl.when(k == pl.num_programs(1) - 1)
    def _():
        o_ref[...] = (acc_ref[...] + b_ref[...]).astype(o_ref.dtype)


def linear_forward(x, w_t, bias, *, tm=None, tk=None):
    """x: (N, F); w_t: (F, H) pre-transposed bf16 weight; bias: (H,) -> (N, H) = x @ W.T + b."""
    N, F = x.shape
    H = w_t.shape[1]
    if tm is None:
        tm = _pick_row_tile(N)
    if tk is None:
        tk = _pick_k_tile(F)
    b2 = bias.reshape(1, H).astype(jnp.float32)   # keep 2D for TPU layout
    return pl.pallas_call(
        _linear_kernel,
        out_shape=jax.ShapeDtypeStruct((N, H), jnp.float32),
        grid_spec=pltpu.PrefetchScalarGridSpec(
            num_scalar_prefetch=0,
            grid=(pl.cdiv(N, tm), pl.cdiv(F, tk)),
            in_specs=[
                pl.BlockSpec((tm, tk), lambda i, k: (i, k)),
                pl.BlockSpec((tk, H), lambda i, k: (k, 0)),   # weight slab, resident across rows
                pl.BlockSpec((1, H), lambda i, k: (0, 0)),    # resident bias
            ],
            out_specs=pl.BlockSpec((tm, H), lambda i, k: (i, 0)),
            scratch_shapes=[pltpu.VMEM((tm, H), jnp.float32)],
        ),
        compiler_params=pltpu.CompilerParams(
            dimension_semantics=("parallel", "arbitrary"),    # rows shard across v7x TCs; K reduces
            vmem_limit_bytes=VMEM_LIMIT),
    )(x, w_t, b2)


def _weighted_hiddens_kernel(hw_ref, q_ref, r_ref, o_ref):
    # BaseModel.weighted_hiddens for a tile of tn nodes:
    #   e = tanh(hw @ Q) . r ; a = softmax over the window axis ; s = mean_w(a_w * hw_w)
    W, tn, H = hw_ref.shape
    hw3 = hw_ref[...]                                     # (W, tn, H) bf16
    hw2 = hw3.astype(jnp.bfloat16).reshape(W * tn, H)     # free relayout (tn multiple of 16)
    # One fused (W*tn, H) @ (H, H) MXU call for all windows, f32 accumulation.
    t = jnp.tanh(jnp.dot(hw2, q_ref[...], preferred_element_type=jnp.float32))
    t3 = t.reshape(W, tn, H)
    # Score via VPU multiply + lane-axis reduce (avoids a 1-column MXU matmul).
    e = jnp.sum(t3 * r_ref[...], axis=-1, keepdims=True)  # (W, tn, 1) f32
    m = jnp.max(e, axis=0, keepdims=True)                 # (1, tn, 1) leading-axis reduce (VPU)
    p = jnp.exp(e - m)                                    # (W, tn, 1)
    denom = jnp.sum(p, axis=0)                            # (tn, 1)
    acc = jnp.sum(p * hw3.astype(jnp.float32), axis=0)    # (tn, H)
    inv = pl.reciprocal(denom * jnp.float32(W), approx=True)   # EUP slot, nearly free
    o_ref[...] = (acc * inv).astype(o_ref.dtype)          # mean over windows


def weighted_hiddens(hidden_window, Q, r, *, num_window, nhid, tn=None):
    """hidden_window: (num_window * N, nhid) -> (N, nhid)."""
    WN, H = hidden_window.shape
    assert H == nhid and WN % num_window == 0
    N = WN // num_window
    hw = hidden_window.reshape(num_window, N, H)          # leading-dim split: free
    if tn is None:
        tn = _pick_row_tile(N)
    r_row = r.reshape(1, H).astype(jnp.float32)           # (1, H) once, outside the kernel
    return pl.pallas_call(
        _weighted_hiddens_kernel,
        out_shape=jax.ShapeDtypeStruct((N, H), jnp.float32),
        grid_spec=pltpu.PrefetchScalarGridSpec(
            num_scalar_prefetch=0,
            grid=(pl.cdiv(N, tn),),
            in_specs=[
                pl.BlockSpec((num_window, tn, H), lambda i: (0, i, 0)),
                pl.BlockSpec((H, H), lambda i: (0, 0)),   # resident Q
                pl.BlockSpec((1, H), lambda i: (0, 0)),   # resident r
            ],
            out_specs=pl.BlockSpec((tn, H), lambda i: (i, 0)),
        ),
        compiler_params=pltpu.CompilerParams(
            dimension_semantics=("parallel",),
            vmem_limit_bytes=VMEM_LIMIT),
    )(hw, Q, r_row)


# ------------------------------ Model wrapper -------------------------------

def glorot(key, shape):
    # PyG-style glorot: uniform(-s, s), s = sqrt(6 / (size(-2) + size(-1)))
    stdv = math.sqrt(6.0 / (shape[-2] + shape[-1]))
    return jax.random.uniform(key, shape, jnp.float32, -stdv, stdv)


class BaseModelPallas:
    def __init__(self, key, num_nodes, nfeat, nhid, num_window, model_type="Bas"):
        k = jax.random.split(key, 6)
        # Matmul operands stored bf16 (native MXU dtype; halves HBM traffic); biases/r stay f32.
        self.feat = glorot(k[0], (num_nodes, nfeat)).astype(jnp.bfloat16)
        self.lin_w = glorot(k[1], (nhid, nfeat))                 # PyTorch (out_features, in_features)
        self.lin_wT = self.lin_w.T.astype(jnp.bfloat16)          # transposed ONCE, reused every call
        bound = 1.0 / math.sqrt(nfeat)
        self.lin_b = jax.random.uniform(k[2], (nhid,), jnp.float32, -bound, bound)
        self.Q = glorot(k[3], (nhid, nhid)).astype(jnp.bfloat16)
        self.r = glorot(k[4], (nhid, 1))
        self.hidden_initial = glorot(k[5], (num_nodes, nhid)).astype(jnp.bfloat16)
        self.nhid = nhid
        self.num_window = num_window
        self.model_type = model_type[:3]
        self.hiddens = None

    def init_hiddens(self):
        self.hiddens = [self.hidden_initial] * self.num_window
        return self.hiddens

    def weighted_hiddens(self, hidden_window):
        return weighted_hiddens(hidden_window, self.Q, self.r,
                                num_window=self.num_window, nhid=self.nhid)

    def forward(self, edge_index, x=None, weight=None):
        if x is None:
            x = linear_forward(self.feat, self.lin_wT, self.lin_b)
        else:
            x = linear_forward(x, self.lin_wT, self.lin_b)
        # TODO(synk): 'Dyn'/'GRU' branches require subclass layers (layer1/layer2, dropout, act,
        # GRUCell); only the BaseModel-defined path (linear projection) is implemented.
        return x


# ---------------------------------- main ------------------------------------

if __name__ == "__main__":
    # Lane-dense, tile-friendly toy shapes: nhid = 128 (unmasked vst), 1024 nodes -> grid of 2
    # (both v7x TensorCores busy), tiles divide evenly so no ragged-edge blocks are hit.
    num_nodes, nfeat, nhid, num_window = 1024, 128, 128, 4

    key = jax.random.PRNGKey(0)
    model = BaseModelPallas(key, num_nodes, nfeat, nhid, num_window, model_type="Bas")
    model.init_hiddens()

    # forward(edge_index, x=None): x = Linear(feat)
    edge_index = jnp.zeros((2, 1), jnp.int32)   # unused by this forward path
    out = model.forward(edge_index, x=None)
    out = jax.block_until_ready(out)

    # Reference uses the same bf16-rounded operands (kernel only differs in accumulation order
    # + approx reciprocal), so tolerances stay tight.
    ref = model.feat.astype(jnp.float32) @ model.lin_wT.astype(jnp.float32) + model.lin_b
    assert out.shape == (num_nodes, nhid)
    assert jnp.allclose(out, ref, atol=5e-3, rtol=5e-3), "linear kernel mismatch"

    # attention pooling (weighted_hiddens) kernel, checked against a plain-JAX reference
    hidden_window = jnp.concatenate(model.hiddens, axis=0)   # (W*N, H) bf16
    s = model.weighted_hiddens(hidden_window)
    s = jax.block_until_ready(s)

    hw_f = hidden_window.astype(jnp.float32)
    e_ref = jnp.matmul(jnp.tanh(jnp.matmul(hw_f, model.Q.astype(jnp.float32))), model.r)
    e_rs = e_ref.reshape(num_window, -1)
    a_ref = jax.nn.softmax(e_rs, axis=0)[..., None]
    hw3 = hw_f.reshape(num_window, -1, nhid)
    s_ref = jnp.mean(a_ref * hw3, axis=0)
    assert s.shape == (num_nodes, nhid)
    assert jnp.allclose(s, s_ref, atol=5e-3, rtol=5e-3), "weighted_hiddens kernel mismatch"

    print("KERNEL_OK")
</pallas_src>

<mosaic_0001>
module attributes {stable_mosaic.version = 11 : i64} {
  func.func @_linear_kernel(%arg0: i32, %arg1: i32, %arg2: memref<512x128xbf16, #tpu.memory_space<vmem>>, %arg3: memref<128x128xbf16, #tpu.memory_space<vmem>>, %arg4: memref<1x128xf32, #tpu.memory_space<vmem>>, %arg5: memref<512x128xf32, #tpu.memory_space<vmem>>, %arg6: memref<512x128xf32, #tpu.memory_space<vmem>>) attributes {dimension_semantics = [#tpu.dimension_semantics<parallel>, #tpu.dimension_semantics<arbitrary>], iteration_bounds = array<i64: 2, 1>, scalar_prefetch = 0 : i64, scratch_operands = 1 : i64, tpu.core_type = #tpu.core_type<tc>, window_params = [{transform_indices = @transform_0, window_bounds = array<i64: 512, 128>}, {transform_indices = @transform_1, window_bounds = array<i64: 128, 128>}, {pipeline_mode = #tpu.pipeline_mode<synchronous>, transform_indices = @transform_2, window_bounds = array<i64: 1, 128>}, {transform_indices = @transform_3, window_bounds = array<i64: 512, 128>}]} {
    %c0_i32 = arith.constant 0 : i32
    %0 = arith.cmpi eq, %arg1, %c0_i32 : i32
    %1 = arith.extui %0 : i1 to i32
    %c0_i32_0 = arith.constant 0 : i32
    %2 = arith.cmpi ne, %1, %c0_i32_0 : i32
    scf.if %2 {
      %cst_10 = arith.constant 0.000000e+00 : f32
      %12 = vector.broadcast %cst_10 : f32 to vector<512x128xf32>
      %c0_11 = arith.constant 0 : index
      %c0_12 = arith.constant 0 : index
      %13 = vector.load %arg6[%c0_11, %c0_12] : memref<512x128xf32, #tpu.memory_space<vmem>>, vector<512x128xf32>
      tpu.vector_store %arg6[%c0_11, %c0_12], %12 {strides = array<i32>} : memref<512x128xf32, #tpu.memory_space<vmem>>, vector<512x128xf32>,
    } else {
    }
    %c0 = arith.constant 0 : index
    %c0_1 = arith.constant 0 : index
    %3 = vector.load %arg6[%c0, %c0_1] : memref<512x128xf32, #tpu.memory_space<vmem>>, vector<512x128xf32>
    %c0_2 = arith.constant 0 : index
    %c0_3 = arith.constant 0 : index
    %4 = vector.load %arg2[%c0_2, %c0_3] : memref<512x128xbf16, #tpu.memory_space<vmem>>, vector<512x128xbf16>
    %c0_4 = arith.constant 0 : index
    %c0_5 = arith.constant 0 : index
    %5 = vector.load %arg3[%c0_4, %c0_5] : memref<128x128xbf16, #tpu.memory_space<vmem>>, vector<128x128xbf16>
    %cst = arith.constant dense<0.000000e+00> : vector<512x128xf32>
    %6 = tpu.matmul %4, %5, %cst {dimension_numbers = #tpu.dot_dimension_numbers<[1], [0], [0], [1], [0, 0, 1, 1], [], []>} : vector<512x128xbf16>, vector<128x128xbf16>, vector<512x128xf32> -> vector<512x128xf32>
    %7 = arith.addf %3, %6 : vector<512x128xf32>
    %c0_6 = arith.constant 0 : index
    %c0_7 = arith.constant 0 : index
    %8 = vector.load %arg6[%c0_6, %c0_7] : memref<512x128xf32, #tpu.memory_space<vmem>>, vector<512x128xf32>
    tpu.vector_store %arg6[%c0_6, %c0_7], %7 {strides = array<i32>} : memref<512x128xf32, #tpu.memory_space<vmem>>, vector<512x128xf32>,
    %c0_i32_8 = arith.constant 0 : i32
    %9 = arith.cmpi eq, %arg1, %c0_i32_8 : i32
    %10 = arith.extui %9 : i1 to i32
    %c0_i32_9 = arith.constant 0 : i32
    %11 = arith.cmpi ne, %10, %c0_i32_9 : i32
    scf.if %11 {
      %c0_10 = arith.constant 0 : index
      %c0_11 = arith.constant 0 : index
      %12 = vector.load %arg6[%c0_10, %c0_11] : memref<512x128xf32, #tpu.memory_space<vmem>>, vector<512x128xf32>
      %c0_12 = arith.constant 0 : index
      %c0_13 = arith.constant 0 : index
      %13 = vector.load %arg4[%c0_12, %c0_13] : memref<1x128xf32, #tpu.memory_space<vmem>>, vector<1x128xf32>
      %14 = vector.broadcast %13 : vector<1x128xf32> to vector<512x128xf32>
      %15 = arith.addf %12, %14 : vector<512x128xf32>
      %c0_14 = arith.constant 0 : index
      %c0_15 = arith.constant 0 : index
      %16 = vector.load %arg5[%c0_14, %c0_15] : memref<512x128xf32, #tpu.memory_space<vmem>>, vector<512x128xf32>
      tpu.vector_store %arg5[%c0_14, %c0_15], %15 {strides = array<i32>} : memref<512x128xf32, #tpu.memory_space<vmem>>, vector<512x128xf32>,
    } else {
    }
    return
  }
  func.func @transform_0(%arg0: i32, %arg1: i32) -> (i32, i32) {
    %c0_i32 = arith.constant 0 : i32
    return %arg0, %arg1 : i32, i32
  }
  func.func @transform_1(%arg0: i32, %arg1: i32) -> (i32, i32) {
    %c0_i32 = arith.constant 0 : i32
    %c0_i32_0 = arith.constant 0 : i32
    return %arg1, %c0_i32 : i32, i32
  }
  func.func @transform_2(%arg0: i32, %arg1: i32) -> (i32, i32) {
    %c0_i32 = arith.constant 0 : i32
    %c0_i32_0 = arith.constant 0 : i32
    %c0_i32_1 = arith.constant 0 : i32
    return %c0_i32, %c0_i32_0 : i32, i32
  }
  func.func @transform_3(%arg0: i32, %arg1: i32) -> (i32, i32) {
    %c0_i32 = arith.constant 0 : i32
    %c0_i32_0 = arith.constant 0 : i32
    return %arg0, %c0_i32 : i32, i32
  }
}

</mosaic_0001>

<bundles_post_ra>
// kernel: tpu_custom_call.1
= control target key start
LH: loop header
LB: loop body
LE: loop exit
PB: predicated region body
PF: predicated region fallthrough
CT: control target
= control target key end

     0   :  { %8 = vsyncpa [#allocation4], 0  ;;  %s2293_s0 = inlined_call_operand.hbm [shape: bf16[1024,128], index: 0, kind: input, shape index: {}]   ;;  %s2294_s1 = inlined_call_operand.hbm [shape: bf16[128,128], index: 1, kind: input, shape index: {}]   ;;  %s2295_s2 = inlined_call_operand.vmem [shape: f32[1,128], index: 2, kind: input, shape index: {}]   ;;  %s2296_s3 = inlined_call_operand.hbm [shape: f32[1024,128], index: 3, kind: output, shape index: {}]  }
   0x1   :  { %10 = vsyncpa [#allocation4 + $0x1], 0 }
   0x2   :  { %11 = vsyncpa [#allocation7], 0 }
   0x3   :  { %12 = vsyncpa [#allocation5], 0 }
   0x4   :  { %14 = vsyncpa [#allocation5 + $0x1], 0  ;;  %s1897_s12 = smov 0   ;;  %s1899_s13 = smov 0  }
   0x5   :  { %s1901_s14 = smov 0   ;;  %s1903_s15 = smov 0  }
   0x6   :  { %s1905_s16 = smov 0   ;;  %s1907_s17 = smov 0  }
   0x7 LB: > { %s1411_s18 = sadd.s32 4294967295, %s1868_s17   ;;  %s1412_s19 = sadd.s32 4294967294, %s1868_s17   ;;  %s1868_s17 = sphi %s1907_s17, %s20_s17   ;;  %s1864_s16 = sphi %s1905_s16, %s2320_s16   ;;  %s1860_s15 = sphi %s1903_s15, %s2319_s15   ;;  %s1856_s14 = sphi %s1901_s14, %s2318_s14   ;;  %s1852_s13 = sphi %s1899_s13, %s2317_s13   ;;  %s1848_s12 = sphi %s1897_s12, %s2316_s12  }
   0x8   : > { %p54_p0 = scmp.ne.s32.totalorder %s1852_s13, %s1848_s12  ;;  %p1931_p1 = scmp.eq.s32.totalorder %s1411_s18, 0 }
   0x9   : > { %p1935_p2 = scmp.eq.s32.totalorder %s1411_s18, 1  ;;  %p131_p3 = scmp.eq.s32.totalorder %s1412_s19, 1 }
   0xa   : > { %s2301_s20 = scalar_select %p1931_p1, 1, 0 }
   0xb   : > { %s2302_s21 = scalar_select %p1935_p2, 1, 0 }
   0xc   : > { %p1941_p4 = por %p1931_p1, %p54_p0  ;;  %p1413_p5 = scmp.ge.s32.totalorder %s1868_s17, 1 }
   0xd   : > { %p1946_p6 = por %p131_p3, %p54_p0  ;;  %p138_p7 = scmp.lt.s32.totalorder %s1868_s17, 3 }
   0xe   : > { %s2303_s22 = scalar_select %p1941_p4, 1, 0 }
   0xf   : > { %s2304_s23 = scalar_select %p1946_p6, 1, 0 }
  0x10   : > { %p1951_p8 = pnand %p1413_p5, %p138_p7  ;;  %s1870_s25 = smov [#allocation6]  }
  0x11   : > { %s153_s26 = sshll.u32 %s1870_s25, 4  ;;  %s32_s28 = sadd.s32 1, %s1864_s16  ;;  %s154_s26 = int_to_ptr.vmem [resolvable:$true] %s153_s26 }
  0x12   : > { %s2305_s24 = scalar_select %p1951_p8, 1, 0 }
  0x13   : > { %p1615_p9 = pneg %p1951_p8  ;;  %s1724_s4 = scalar_lea.hbm %s2294_s1, 1024 }
  0x14   : > { %p1725_p12 = scmp.ne.s32.totalorder %s2294_s1, %s1724_s4  ;;  %p1731_p5 = scmp.lt.u32.totalorder %s1724_s4, %s2294_s1 }
  0x15   : > { %p1960_p11 = pnand %p1615_p9, %p1931_p1 }
  0x17   : > { %p1726_p13 = pneg %p1960_p11 }
  0x19   : > { %p1727_p0 = pnand %p1726_p13, %p1725_p12 }
  0x1b   : > { %p1728_p3 = pneg %p1727_p0 }
  0x1d   : > { %p1733_p7 = pnand %p1731_p5, %p1728_p3 }
  0x1f   : > { %1736 = shalt.err (!%p1733_p7)
}
  0x20   : > { %s1737_s9 = scalar_lea.vmem %s154_s26, 1024  ;;  %p1745_p1 = scmp.lt.s32.totalorder %s154_s26, %s154_s26 }
  0x21   : > { %p1738_p9 = scmp.ne.s32.totalorder %s154_s26, %s1737_s9  ;;  %p1746_p4 = scmp.lt.s32.totalorder %s1737_s9, %s1737_s9 }
  0x23   : > { %p1740_p10 = pnand %p1738_p9, %p1726_p13  ;;  %p1747_p8 = por %p1746_p4, %p1745_p1 }
  0x25   : > { %p1741_p6 = pneg %p1740_p10 }
  0x27   : > { %p1748_p2 = pnand %p1747_p8, %p1741_p6 }
  0x29   : > { %1751 = shalt.err (!%p1748_p2)
}
  0x2a   : > { %s1871_s10 = smov 64   ;;  %s1872_s11 = smov 4  }
  0x2b   : > { %1618 = dma.hbm_to_vmem [thread:$0]  (!%p1960_p11), %s2294_s1, 1024, %s154_s26, [#allocation7], %s1871_s10, %s1871_s10, %s1872_s11  }
  0x2c   : > { %p34_p1 = scmp.ge.s32.totalorder %s32_s28, 2  ;;  %s41_s25 = sadd.s32 1, %s1856_s14 }
  0x2d   : > { %p48_p2 = scmp.ne.s32.totalorder %s1856_s14, %s1852_s13  ;;  %p49_p4 = scmp.eq.s32.totalorder %s1868_s17, 0 }
  0x2e   : > { %s2322_s28 = smov (%p34_p1, %s32_s28), 0  ;;  %p2308_p8 = scmp.ne.s32.totalorder %s2302_s21, 0 }
  0x2f   : > { %p1990_p6 = por %p49_p4, %p48_p2  ;;  %s36_s30 = ssub.s32 %s1864_s16, %s2322_s28 }
  0x30   : > { %p1996_p10 = por %p2308_p8, %p48_p2  ;;  %p1628_p12 = scmp.lt.s32.totalorder %s1868_s17, 2 }
  0x31   : > { %p39_p11 = scmp.eq.s32.totalorder %s36_s30, 0  ;;  %s170_s26 = sand.u32 1, %s1856_s14  }
  0x32   : > { %s1416_s4 = sshll.u32 %s170_s26, 8  ;;  %s1469_s6 = sshll.u32 %s1864_s16, 12 }
  0x33   : > { %s2005_s5 = scalar_select %p39_p11, %s1856_s14, %s41_s25  }
  0x34   : > { %s2011_s9 = scalar_lea.hbm %s2293_s0, %s1469_s6  ;;  %s174_s21 = scalar_lea.vmem [#allocation3], %s1416_s4 }
  0x35   : > { %s182_s18 = sshll.u32 %s174_s21, 4  ;;  %p2017_p13 = pnand %p1628_p12, %p1990_p6  ;;  %s2013_s18 = int_to_ptr.vmem [resolvable:$true] %s182_s18 }
  0x36   : > { %s2021_s25 = scalar_lea.sflag [#allocation4], %s170_s26  ;;  %s1752_s30 = scalar_lea.hbm %s2011_s9, 4096 }
  0x37   : > { %p1753_p0 = scmp.ne.s32.totalorder %s2011_s9, %s1752_s30  ;;  %p1754_p3 = pneg %p2017_p13 }
  0x38   : > { %s1757_s29 = scalar_lea.hbm %s2293_s0, 8192  ;;  %p1758_p9 = scmp.lt.u32.totalorder %s2011_s9, %s2293_s0 }
  0x39   : > { %p1755_p5 = pnand %p1754_p3, %p1753_p0  ;;  %p1759_p1 = scmp.lt.u32.totalorder %s1757_s29, %s1752_s30 }
  0x3a   : > { %p1761_p4 = scmp.lt.u32.totalorder %s1752_s30, %s2011_s9 }
  0x3b   : > { %p1756_p7 = pneg %p1755_p5  ;;  %p1760_p2 = por %p1759_p1, %p1758_p9 }
  0x3d   : > { %p1762_p6 = por %p1761_p4, %p1760_p2 }
  0x3f   : > { %p1763_p8 = pnand %p1762_p6, %p1756_p7 }
  0x41   : > { %1766 = shalt.err (!%p1763_p8)
}
  0x42   : > { %s1767_s26 = scalar_lea.vmem %s2013_s18, 4096  ;;  %s1873_s21 = smov [#allocation3]  }
  0x43   : > { %p1768_p12 = scmp.ne.s32.totalorder %s2013_s18, %s1767_s26  ;;  %s1772_s4 = sshll.u32 %s1873_s21, 4  ;;  %s1773_s4 = int_to_ptr.vmem [resolvable:$false] %s1772_s4 }
  0x44   : > { %s1774_s6 = scalar_lea.vmem %s1773_s4, 8192  ;;  %p1775_p5 = scmp.lt.s32.totalorder %s2013_s18, %s1773_s4 }
  0x45   : > { %p1770_p11 = pnand %p1768_p12, %p1754_p3  ;;  %p1776_p9 = scmp.lt.s32.totalorder %s1774_s6, %s1767_s26 }
  0x47   : > { %p1771_p0 = pneg %p1770_p11  ;;  %p1777_p1 = por %p1776_p9, %p1775_p5 }
  0x49   : > { %p1778_p2 = pnand %p1777_p1, %p1771_p0 }
  0x4b   : > { %1781 = shalt.err (!%p1778_p2)
}
  0x4c   : > { %1622 = dma.hbm_to_vmem [thread:$0]  (!%p2017_p13), %s2011_s9, 4096, %s2013_s18, %s2021_s25, %s1871_s10, %s1871_s10, %s1872_s11  }
  0x4d   : > { %p2311_p3 = scmp.ne.s32.totalorder %s2305_s24, 0 }
  0x4e   : > { %s2055_s30 = sand.u32 (!%p2311_p3), 1, %s1852_s13   ;;  %p2312_p7 = scmp.ne.s32.totalorder (!%p2311_p3), %s2303_s22, 0 }
  0x4f   : > { %194 = sbr.rel (%p2311_p3) target bundleno = 411 (0x19b), region = 32  ;;  %s1420_s29 = sshll.u32 (!%p2311_p3), %s2055_s30, 8 }
  0x50   : > { %s197_s7 = scalar_lea.sflag (!%p2311_p3), [#allocation4], %s2055_s30  ;;  %s2059_s8 = scalar_lea.vmem (!%p2311_p3), [#allocation3], %s1420_s29 }
  0x56   : > { %1835 = dma.done.wait (%p2312_p7), %s197_s7, 4096  }
  0x57   : > { %1837 = vsyncadd (%p2312_p7), %s197_s7, 4294963200  ;;  %p2313_p13 = scmp.ne.s32.totalorder %s2301_s20, 0 }
  0x59   : > { %1839 = dma.done.wait (%p2313_p13), [#allocation7], 1024  }
  0x5a   : > { %1841 = vsyncadd (%p2313_p13), [#allocation7], 4294966272  ;;  %v1684_v0 = vld [vmem:[#allocation6] sm:$0xff]   ;;  %v1685_v1 = vld [vmem:[#allocation6 + $0x8] sm:$0xff]   ;;  %s1422_s20 = sshll.u32 %s2055_s30, 9  ;;  %s1470_s11 = sshll.u32 %s1860_s15, 13 }
  0x5b   : > { %1511 = vmatprep.subr.bf16.mxu0 %v1684_v0  ;;  %1591 = vmatprep.subr.bf16.mxu1 %v1684_v0  ;;  %v1686_v2 = vld [vmem:[#allocation6 + $0x10] sm:$0xff]   ;;  %v1687_v3 = vld [vmem:[#allocation6 + $0x18] sm:$0xff]   ;;  %v1692_v4 = vld [vmem:[%s2059_s8] sm:$0xff]   ;;  %s2111_s10 = scalar_lea.vmem [#allocation8], %s1422_s20  ;;  %s2234_s19 = scalar_lea.hbm %s2296_s3, %s1470_s11 }
  0x5c   : > { %1512 = vmatpush3.bf16.msra.mxu0 %v1684_v0  ;;  %1599 = vmatpush3.bf16.msra.mxu1 %v1684_v0  ;;  %v1693_v5 = vld [vmem:[%s2059_s8 + $0x80] sm:$0xff]   ;;  %v1689_v7 = vld [vmem:[#allocation6 + $0x28] sm:$0xff]   ;;  %v1690_v8 = vld [vmem:[#allocation6 + $0x30] sm:$0xff]   ;;  %s1316_s9 = sshll.u32 %s2111_s10, 4  ;;  %s1303_s25 = scalar_lea.sflag [#allocation5], %s2055_s30  ;;  %s2236_s9 = int_to_ptr.vmem [resolvable:$true] %s1316_s9 }
  0x5d   : > { %1513 = vmatprep.subr.bf16.mxu0 %v1685_v1  ;;  %1592 = vmatprep.subr.bf16.mxu1 %v1685_v1  ;;  %v1688_v6 = vld [vmem:[#allocation6 + $0x20] sm:$0xff]   ;;  %v1691_v9 = vld [vmem:[#allocation6 + $0x38] sm:$0xff]   ;;  %v1694_v10 = vld [vmem:[%s2059_s8 + $0x8] sm:$0xff]   ;;  %s1782_s26 = scalar_lea.vmem %s2236_s9, 8192  ;;  %s1874_s21 = smov [#allocation8]  }
  0x5e   : > { %1527 = vmatprep.mubr.bf16.mxu0 %v1692_v4  ;;  %1559 = vmatprep.mubr.bf16.mxu1 %v1693_v5  ;;  %v1695_v11 = vld [vmem:[%s2059_s8 + $0x88] sm:$0xff]   ;;  %v1696_v12 = vld [vmem:[%s2059_s8 + $0x10] sm:$0xff]   ;;  %v1698_v14 = vld [vmem:[%s2059_s8 + $0x18] sm:$0xff]   ;;  %p1783_p4 = scmp.ne.s32.totalorder %s2236_s9, %s1782_s26  ;;  %s1786_s4 = sshll.u32 %s1874_s21, 4  ;;  %s1787_s4 = int_to_ptr.vmem [resolvable:$false] %s1786_s4 }
  0x5f   : > { %v1697_v13 = vld [vmem:[%s2059_s8 + $0x90] sm:$0xff]   ;;  %v1699_v15 = vld [vmem:[%s2059_s8 + $0x98] sm:$0xff]   ;;  %v1700_v16 = vld [vmem:[%s2059_s8 + $0x20] sm:$0xff]   ;;  %s1788_s6 = scalar_lea.vmem %s1787_s4, 16384  ;;  %p1789_p12 = scmp.lt.s32.totalorder %s2236_s9, %s1787_s4 }
  0x60   : > { %1514 = vmatpush3.bf16.msra.mxu0 %v1685_v1  ;;  %1600 = vmatpush3.bf16.msra.mxu1 %v1685_v1  ;;  %v1701_v17 = vld [vmem:[%s2059_s8 + $0xa0] sm:$0xff]   ;;  %v1702_v18 = vld [vmem:[%s2059_s8 + $0x28] sm:$0xff]   ;;  %v1704_v20 = vld [vmem:[%s2059_s8 + $0x30] sm:$0xff]   ;;  %p1784_p6 = pnand %p1783_p4, %p1996_p10  ;;  %p1790_p11 = scmp.lt.s32.totalorder %s1788_s6, %s1782_s26 }
  0x61   : > { %1515 = vmatprep.subr.bf16.mxu0 %v1686_v2  ;;  %1593 = vmatprep.subr.bf16.mxu1 %v1686_v2  ;;  %v1703_v19 = vld [vmem:[%s2059_s8 + $0xa8] sm:$0xff]   ;;  %v1705_v21 = vld [vmem:[%s2059_s8 + $0xb0] sm:$0xff]   ;;  %v1706_v22 = vld [vmem:[%s2059_s8 + $0x38] sm:$0xff]  }
  0x62   : > { %v1707_v23 = vld [vmem:[%s2059_s8 + $0xb8] sm:$0xff]   ;;  %v1708_v24 = vld [vmem:[%s2059_s8 + $0x40] sm:$0xff]   ;;  %v1710_v26 = vld [vmem:[%s2059_s8 + $0x48] sm:$0xff]   ;;  %p1785_p8 = pneg %p1784_p6  ;;  %p1791_p0 = por %p1790_p11, %p1789_p12 }
  0x63   : > { %v1709_v25 = vld [vmem:[%s2059_s8 + $0xc0] sm:$0xff]   ;;  %v1711_v27 = vld [vmem:[%s2059_s8 + $0xc8] sm:$0xff]   ;;  %v1712_v28 = vld [vmem:[%s2059_s8 + $0x50] sm:$0xff]  }
  0x64   : > { %1516 = vmatpush3.bf16.msra.mxu0 %v1686_v2  ;;  %1601 = vmatpush3.bf16.msra.mxu1 %v1686_v2  ;;  %v1713_v29 = vld [vmem:[%s2059_s8 + $0xd0] sm:$0xff]   ;;  %v1714_v30 = vld [vmem:[%s2059_s8 + $0x58] sm:$0xff]   ;;  %v1716_v32 = vld [vmem:[%s2059_s8 + $0x60] sm:$0xff]   ;;  %p1792_p5 = pnand %p1791_p0, %p1785_p8 }
  0x65   : > { %1517 = vmatprep.subr.bf16.mxu0 %v1687_v3  ;;  %1594 = vmatprep.subr.bf16.mxu1 %v1687_v3  ;;  %v1715_v31 = vld [vmem:[%s2059_s8 + $0xd8] sm:$0xff]   ;;  %v1717_v33 = vld [vmem:[%s2059_s8 + $0xe0] sm:$0xff]   ;;  %v1718_v34 = vld [vmem:[%s2059_s8 + $0x68] sm:$0xff]  }
  0x66   : > { %v1719_v35 = vld [vmem:[%s2059_s8 + $0xe8] sm:$0xff]   ;;  %v1720_v36 = vld [vmem:[%s2059_s8 + $0x70] sm:$0xff]   ;;  %v1722_v38 = vld [vmem:[%s2059_s8 + $0x78] sm:$0xff]  }
  0x67   : > { %v1721_v37 = vld [vmem:[%s2059_s8 + $0xf0] sm:$0xff]   ;;  %v1723_v39 = vld [vmem:[%s2059_s8 + $0xf8] sm:$0xff]   ;;  %v2105_v40 = vld [vmem:[%s2295_s2] ss:$0 sm:$0xff] }
  0x68   : > { %1518 = vmatpush3.bf16.msra.mxu0 %v1687_v3  ;;  %1602 = vmatpush3.bf16.msra.mxu1 %v1687_v3 }
  0x69   : > { %1519 = vmatprep.subr.bf16.mxu0 %v1688_v6  ;;  %1595 = vmatprep.subr.bf16.mxu1 %v1688_v6 }
  0x6c   : > { %1520 = vmatpush3.bf16.msra.mxu0 %v1688_v6  ;;  %1603 = vmatpush3.bf16.msra.mxu1 %v1688_v6 }
  0x6d   : > { %1521 = vmatprep.subr.bf16.mxu0 %v1689_v7  ;;  %1596 = vmatprep.subr.bf16.mxu1 %v1689_v7 }
  0x70   : > { %1522 = vmatpush3.bf16.msra.mxu0 %v1689_v7  ;;  %1604 = vmatpush3.bf16.msra.mxu1 %v1689_v7 }
  0x71   : > { %1523 = vmatprep.subr.bf16.mxu0 %v1690_v8  ;;  %1597 = vmatprep.subr.bf16.mxu1 %v1690_v8 }
  0x74   : > { %1524 = vmatpush3.bf16.msra.mxu0 %v1690_v8  ;;  %1605 = vmatpush3.bf16.msra.mxu1 %v1690_v8 }
  0x75   : > { %1525 = vmatprep.subr.bf16.mxu0 %v1691_v9  ;;  %1598 = vmatprep.subr.bf16.mxu1 %v1691_v9 }
  0x78   : > { %1526 = vmatpush3.bf16.msra.mxu0 %v1691_v9  ;;  %1606 = vmatpush3.bf16.msra.mxu1 %v1691_v9 }
  0x7b   : > { %1528 = vmatmul.mubr.bf16.vlgmr.msra.gmra.mrb[0].mxu0 %v1694_v10  ;;  %1560 = vmatmul.mubr.bf16.vlgmr.msra.gmra.mrb[0].mxu1 %v1695_v11 }
  0x7c   : > { %1531 = vmatprep.mubr.bf16.mxu0 %v1696_v12  ;;  %1563 = vmatprep.mubr.bf16.mxu1 %v1697_v13 }
  0x83   : > { %1532 = vmatmul.mubr.bf16.gmra.mrb[4].mxu0 %v1698_v14  ;;  %1564 = vmatmul.mubr.bf16.gmra.mrb[4].mxu1 %v1699_v15 }
  0x84   : > { %1535 = vmatprep.mubr.bf16.mxu0 %v1700_v16  ;;  %1567 = vmatprep.mubr.bf16.mxu1 %v1701_v17 }
  0x8b   : > { %1536 = vmatmul.mubr.bf16.gmra.mrb[8].mxu0 %v1702_v18  ;;  %1568 = vmatmul.mubr.bf16.gmra.mrb[8].mxu1 %v1703_v19 }
  0x8c   : > { %1539 = vmatprep.mubr.bf16.mxu0 %v1704_v20  ;;  %1571 = vmatprep.mubr.bf16.mxu1 %v1705_v21 }
  0x93   : > { %1540 = vmatmul.mubr.bf16.gmra.mrb[12].mxu0 %v1706_v22  ;;  %1572 = vmatmul.mubr.bf16.gmra.mrb[12].mxu1 %v1707_v23 }
  0x94   : > { %1543 = vmatprep.mubr.bf16.mxu0 %v1708_v24  ;;  %1575 = vmatprep.mubr.bf16.mxu1 %v1709_v25 }
  0x9b   : > { %1544 = vmatmul.mubr.bf16.gmra.mrb[16].mxu0 %v1710_v26  ;;  %1576 = vmatmul.mubr.bf16.gmra.mrb[16].mxu1 %v1711_v27 }
  0x9c   : > { %1547 = vmatprep.mubr.bf16.mxu0 %v1712_v28  ;;  %1579 = vmatprep.mubr.bf16.mxu1 %v1713_v29 }
  0xa3   : > { %1548 = vmatmul.mubr.bf16.gmra.mrb[20].mxu0 %v1714_v30  ;;  %1580 = vmatmul.mubr.bf16.gmra.mrb[20].mxu1 %v1715_v31 }
  0xa4   : > { %1551 = vmatprep.mubr.bf16.mxu0 %v1716_v32  ;;  %1583 = vmatprep.mubr.bf16.mxu1 %v1717_v33 }
  0xab   : > { %1552 = vmatmul.mubr.bf16.gmra.mrb[24].mxu0 %v1718_v34  ;;  %1584 = vmatmul.mubr.bf16.gmra.mrb[24].mxu1 %v1719_v35 }
  0xac   : > { %1555 = vmatprep.mubr.bf16.mxu0 %v1720_v36  ;;  %1587 = vmatprep.mubr.bf16.mxu1 %v1721_v37 }
  0xb3   : > { %1556 = vmatmul.mubr.bf16.gmra.mrb[28].mxu0 %v1722_v38  ;;  %1588 = vmatmul.mubr.bf16.gmra.mrb[28].mxu1 %v1723_v39 }
 0x14e   : > { %v1529_v41 = vpop.f32.mrb[0].mxu0  ;;  %v1561_v42 = vpop.f32.mrb[0].mxu1 }
 0x14f   : > { %v1176_v43 = vadd.f32 %v1529_v41, %v2105_v40  ;;  %v1208_v44 = vadd.f32 %v1561_v42, %v2105_v40  ;;  %v717_v45 = vpop.f32.mrb[1].mxu0  ;;  %v845_v46 = vpop.f32.mrb[1].mxu1 }
 0x150   : > { %v1174_v47 = vadd.f32 %v2105_v40, %v717_v45  ;;  %v1206_v48 = vadd.f32 %v2105_v40, %v845_v46  ;;  %v1530_v49 = vpop.f32.mrb[2].mxu0  ;;  %v1562_v50 = vpop.f32.mrb[2].mxu1 }
 0x151   : > { %1240 = vst [vmem:[%s2111_s10 + $0x10] sm:$0xff] %v1176_v43  ;;  %1272 = vst [vmem:[%s2111_s10 + $0x110] sm:$0xff] %v1208_v44  ;;  %v1177_v51 = vadd.f32 %v1530_v49, %v2105_v40  ;;  %v1209_v52 = vadd.f32 %v1562_v50, %v2105_v40  ;;  %v720_v53 = vpop.f32.mrb[3].mxu0  ;;  %v848_v54 = vpop.f32.mrb[3].mxu1 }
 0x152   : > { %1238 = vst [vmem:[%s2111_s10] sm:$0xff] %v1174_v47  ;;  %1270 = vst [vmem:[%s2111_s10 + $0x100] sm:$0xff] %v1206_v48  ;;  %v1175_v55 = vadd.f32 %v2105_v40, %v720_v53  ;;  %v1207_v56 = vadd.f32 %v2105_v40, %v848_v54 }
 0x153   : > { %1241 = vst [vmem:[%s2111_s10 + $0x18] sm:$0xff] %v1177_v51  ;;  %1273 = vst [vmem:[%s2111_s10 + $0x118] sm:$0xff] %v1209_v52 }
 0x154   : > { %1239 = vst [vmem:[%s2111_s10 + $0x8] sm:$0xff] %v1175_v55  ;;  %1271 = vst [vmem:[%s2111_s10 + $0x108] sm:$0xff] %v1207_v56 }
 0x156   : > { %v1533_v57 = vpop.f32.mrb[4].mxu0  ;;  %v1565_v58 = vpop.f32.mrb[4].mxu1 }
 0x157   : > { %v1180_v59 = vadd.f32 %v1533_v57, %v2105_v40  ;;  %v1212_v60 = vadd.f32 %v1565_v58, %v2105_v40  ;;  %v733_v61 = vpop.f32.mrb[5].mxu0  ;;  %v861_v62 = vpop.f32.mrb[5].mxu1 }
 0x158   : > { %v1178_v63 = vadd.f32 %v2105_v40, %v733_v61  ;;  %v1210_v0 = vadd.f32 %v2105_v40, %v861_v62  ;;  %v1534_v1 = vpop.f32.mrb[6].mxu0  ;;  %v1566_v2 = vpop.f32.mrb[6].mxu1 }
 0x159   : > { %1244 = vst [vmem:[%s2111_s10 + $0x30] sm:$0xff] %v1180_v59  ;;  %1276 = vst [vmem:[%s2111_s10 + $0x130] sm:$0xff] %v1212_v60  ;;  %v1181_v3 = vadd.f32 %v1534_v1, %v2105_v40  ;;  %v1213_v4 = vadd.f32 %v1566_v2, %v2105_v40  ;;  %v736_v5 = vpop.f32.mrb[7].mxu0  ;;  %v864_v6 = vpop.f32.mrb[7].mxu1 }
 0x15a   : > { %1242 = vst [vmem:[%s2111_s10 + $0x20] sm:$0xff] %v1178_v63  ;;  %1274 = vst [vmem:[%s2111_s10 + $0x120] sm:$0xff] %v1210_v0  ;;  %v1179_v7 = vadd.f32 %v2105_v40, %v736_v5  ;;  %v1211_v8 = vadd.f32 %v2105_v40, %v864_v6 }
 0x15b   : > { %1245 = vst [vmem:[%s2111_s10 + $0x38] sm:$0xff] %v1181_v3  ;;  %1277 = vst [vmem:[%s2111_s10 + $0x138] sm:$0xff] %v1213_v4 }
 0x15c   : > { %1243 = vst [vmem:[%s2111_s10 + $0x28] sm:$0xff] %v1179_v7  ;;  %1275 = vst [vmem:[%s2111_s10 + $0x128] sm:$0xff] %v1211_v8 }
 0x15e   : > { %v1537_v9 = vpop.f32.mrb[8].mxu0  ;;  %v1569_v10 = vpop.f32.mrb[8].mxu1 }
 0x15f   : > { %v1184_v11 = vadd.f32 %v1537_v9, %v2105_v40  ;;  %v1216_v12 = vadd.f32 %v1569_v10, %v2105_v40  ;;  %v749_v13 = vpop.f32.mrb[9].mxu0  ;;  %v877_v14 = vpop.f32.mrb[9].mxu1 }
 0x160   : > { %v1182_v15 = vadd.f32 %v2105_v40, %v749_v13  ;;  %v1214_v16 = vadd.f32 %v2105_v40, %v877_v14  ;;  %v1538_v17 = vpop.f32.mrb[10].mxu0  ;;  %v1570_v18 = vpop.f32.mrb[10].mxu1 }
 0x161   : > { %1248 = vst [vmem:[%s2111_s10 + $0x50] sm:$0xff] %v1184_v11  ;;  %1280 = vst [vmem:[%s2111_s10 + $0x150] sm:$0xff] %v1216_v12  ;;  %v1185_v19 = vadd.f32 %v1538_v17, %v2105_v40  ;;  %v1217_v20 = vadd.f32 %v1570_v18, %v2105_v40  ;;  %v752_v21 = vpop.f32.mrb[11].mxu0  ;;  %v880_v22 = vpop.f32.mrb[11].mxu1 }
 0x162   : > { %1246 = vst [vmem:[%s2111_s10 + $0x40] sm:$0xff] %v1182_v15  ;;  %1278 = vst [vmem:[%s2111_s10 + $0x140] sm:$0xff] %v1214_v16  ;;  %v1183_v23 = vadd.f32 %v2105_v40, %v752_v21  ;;  %v1215_v24 = vadd.f32 %v2105_v40, %v880_v22 }
 0x163   : > { %1249 = vst [vmem:[%s2111_s10 + $0x58] sm:$0xff] %v1185_v19  ;;  %1281 = vst [vmem:[%s2111_s10 + $0x158] sm:$0xff] %v1217_v20 }
 0x164   : > { %1247 = vst [vmem:[%s2111_s10 + $0x48] sm:$0xff] %v1183_v23  ;;  %1279 = vst [vmem:[%s2111_s10 + $0x148] sm:$0xff] %v1215_v24 }
 0x166   : > { %v1541_v25 = vpop.f32.mrb[12].mxu0  ;;  %v1573_v26 = vpop.f32.mrb[12].mxu1 }
 0x167   : > { %v1188_v27 = vadd.f32 %v1541_v25, %v2105_v40  ;;  %v1220_v28 = vadd.f32 %v1573_v26, %v2105_v40  ;;  %v765_v29 = vpop.f32.mrb[13].mxu0  ;;  %v893_v30 = vpop.f32.mrb[13].mxu1 }
 0x168   : > { %v1186_v31 = vadd.f32 %v2105_v40, %v765_v29  ;;  %v1218_v32 = vadd.f32 %v2105_v40, %v893_v30  ;;  %v1542_v33 = vpop.f32.mrb[14].mxu0  ;;  %v1574_v34 = vpop.f32.mrb[14].mxu1 }
 0x169   : > { %1252 = vst [vmem:[%s2111_s10 + $0x70] sm:$0xff] %v1188_v27  ;;  %1284 = vst [vmem:[%s2111_s10 + $0x170] sm:$0xff] %v1220_v28  ;;  %v1189_v35 = vadd.f32 %v1542_v33, %v2105_v40  ;;  %v1221_v36 = vadd.f32 %v1574_v34, %v2105_v40  ;;  %v768_v37 = vpop.f32.mrb[15].mxu0  ;;  %v896_v38 = vpop.f32.mrb[15].mxu1 }
 0x16a   : > { %1250 = vst [vmem:[%s2111_s10 + $0x60] sm:$0xff] %v1186_v31  ;;  %1282 = vst [vmem:[%s2111_s10 + $0x160] sm:$0xff] %v1218_v32  ;;  %v1187_v39 = vadd.f32 %v2105_v40, %v768_v37  ;;  %v1219_v41 = vadd.f32 %v2105_v40, %v896_v38 }
 0x16b   : > { %1253 = vst [vmem:[%s2111_s10 + $0x78] sm:$0xff] %v1189_v35  ;;  %1285 = vst [vmem:[%s2111_s10 + $0x178] sm:$0xff] %v1221_v36 }
 0x16c   : > { %1251 = vst [vmem:[%s2111_s10 + $0x68] sm:$0xff] %v1187_v39  ;;  %1283 = vst [vmem:[%s2111_s10 + $0x168] sm:$0xff] %v1219_v41 }
 0x16e   : > { %v1545_v42 = vpop.f32.mrb[16].mxu0  ;;  %v1577_v43 = vpop.f32.mrb[16].mxu1 }
 0x16f   : > { %v1192_v44 = vadd.f32 %v1545_v42, %v2105_v40  ;;  %v1224_v45 = vadd.f32 %v1577_v43, %v2105_v40  ;;  %v781_v46 = vpop.f32.mrb[17].mxu0  ;;  %v909_v47 = vpop.f32.mrb[17].mxu1 }
 0x170   : > { %v1190_v48 = vadd.f32 %v2105_v40, %v781_v46  ;;  %v1222_v49 = vadd.f32 %v2105_v40, %v909_v47  ;;  %v1546_v50 = vpop.f32.mrb[18].mxu0  ;;  %v1578_v51 = vpop.f32.mrb[18].mxu1 }
 0x171   : > { %1256 = vst [vmem:[%s2111_s10 + $0x90] sm:$0xff] %v1192_v44  ;;  %1288 = vst [vmem:[%s2111_s10 + $0x190] sm:$0xff] %v1224_v45  ;;  %v1193_v52 = vadd.f32 %v1546_v50, %v2105_v40  ;;  %v1225_v53 = vadd.f32 %v1578_v51, %v2105_v40  ;;  %v784_v54 = vpop.f32.mrb[19].mxu0  ;;  %v912_v55 = vpop.f32.mrb[19].mxu1 }
 0x172   : > { %1254 = vst [vmem:[%s2111_s10 + $0x80] sm:$0xff] %v1190_v48  ;;  %1286 = vst [vmem:[%s2111_s10 + $0x180] sm:$0xff] %v1222_v49  ;;  %v1191_v56 = vadd.f32 %v2105_v40, %v784_v54  ;;  %v1223_v57 = vadd.f32 %v2105_v40, %v912_v55 }
 0x173   : > { %1257 = vst [vmem:[%s2111_s10 + $0x98] sm:$0xff] %v1193_v52  ;;  %1289 = vst [vmem:[%s2111_s10 + $0x198] sm:$0xff] %v1225_v53 }
 0x174   : > { %1255 = vst [vmem:[%s2111_s10 + $0x88] sm:$0xff] %v1191_v56  ;;  %1287 = vst [vmem:[%s2111_s10 + $0x188] sm:$0xff] %v1223_v57 }
 0x176   : > { %v1549_v58 = vpop.f32.mrb[20].mxu0  ;;  %v1581_v59 = vpop.f32.mrb[20].mxu1 }
 0x177   : > { %v1196_v60 = vadd.f32 %v1549_v58, %v2105_v40  ;;  %v1228_v61 = vadd.f32 %v1581_v59, %v2105_v40  ;;  %v797_v62 = vpop.f32.mrb[21].mxu0  ;;  %v925_v63 = vpop.f32.mrb[21].mxu1 }
 0x178   : > { %v1194_v0 = vadd.f32 %v2105_v40, %v797_v62  ;;  %v1226_v1 = vadd.f32 %v2105_v40, %v925_v63  ;;  %v1550_v2 = vpop.f32.mrb[22].mxu0  ;;  %v1582_v3 = vpop.f32.mrb[22].mxu1 }
 0x179   : > { %1260 = vst [vmem:[%s2111_s10 + $0xb0] sm:$0xff] %v1196_v60  ;;  %1292 = vst [vmem:[%s2111_s10 + $0x1b0] sm:$0xff] %v1228_v61  ;;  %v1197_v4 = vadd.f32 %v1550_v2, %v2105_v40  ;;  %v1229_v5 = vadd.f32 %v1582_v3, %v2105_v40  ;;  %v800_v6 = vpop.f32.mrb[23].mxu0  ;;  %v928_v7 = vpop.f32.mrb[23].mxu1 }
 0x17a   : > { %1258 = vst [vmem:[%s2111_s10 + $0xa0] sm:$0xff] %v1194_v0  ;;  %1290 = vst [vmem:[%s2111_s10 + $0x1a0] sm:$0xff] %v1226_v1  ;;  %v1195_v8 = vadd.f32 %v2105_v40, %v800_v6  ;;  %v1227_v9 = vadd.f32 %v2105_v40, %v928_v7 }
 0x17b   : > { %1261 = vst [vmem:[%s2111_s10 + $0xb8] sm:$0xff] %v1197_v4  ;;  %1293 = vst [vmem:[%s2111_s10 + $0x1b8] sm:$0xff] %v1229_v5 }
 0x17c   : > { %1259 = vst [vmem:[%s2111_s10 + $0xa8] sm:$0xff] %v1195_v8  ;;  %1291 = vst [vmem:[%s2111_s10 + $0x1a8] sm:$0xff] %v1227_v9 }
 0x17e   : > { %v1553_v10 = vpop.f32.mrb[24].mxu0  ;;  %v1585_v11 = vpop.f32.mrb[24].mxu1 }
 0x17f   : > { %v1200_v12 = vadd.f32 %v1553_v10, %v2105_v40  ;;  %v1232_v13 = vadd.f32 %v1585_v11, %v2105_v40  ;;  %v813_v14 = vpop.f32.mrb[25].mxu0  ;;  %v941_v15 = vpop.f32.mrb[25].mxu1 }
 0x180   : > { %v1198_v16 = vadd.f32 %v2105_v40, %v813_v14  ;;  %v1230_v17 = vadd.f32 %v2105_v40, %v941_v15  ;;  %v1554_v18 = vpop.f32.mrb[26].mxu0  ;;  %v1586_v19 = vpop.f32.mrb[26].mxu1 }
 0x181   : > { %1264 = vst [vmem:[%s2111_s10 + $0xd0] sm:$0xff] %v1200_v12  ;;  %1296 = vst [vmem:[%s2111_s10 + $0x1d0] sm:$0xff] %v1232_v13  ;;  %v1201_v20 = vadd.f32 %v1554_v18, %v2105_v40  ;;  %v1233_v21 = vadd.f32 %v1586_v19, %v2105_v40  ;;  %v816_v22 = vpop.f32.mrb[27].mxu0  ;;  %v944_v23 = vpop.f32.mrb[27].mxu1 }
 0x182   : > { %1262 = vst [vmem:[%s2111_s10 + $0xc0] sm:$0xff] %v1198_v16  ;;  %1294 = vst [vmem:[%s2111_s10 + $0x1c0] sm:$0xff] %v1230_v17  ;;  %v1199_v24 = vadd.f32 %v2105_v40, %v816_v22  ;;  %v1231_v25 = vadd.f32 %v2105_v40, %v944_v23 }
 0x183   : > { %1265 = vst [vmem:[%s2111_s10 + $0xd8] sm:$0xff] %v1201_v20  ;;  %1297 = vst [vmem:[%s2111_s10 + $0x1d8] sm:$0xff] %v1233_v21 }
 0x184   : > { %1263 = vst [vmem:[%s2111_s10 + $0xc8] sm:$0xff] %v1199_v24  ;;  %1295 = vst [vmem:[%s2111_s10 + $0x1c8] sm:$0xff] %v1231_v25 }
 0x186   : > { %v1557_v26 = vpop.f32.mrb[28].mxu0  ;;  %v1589_v27 = vpop.f32.mrb[28].mxu1 }
 0x187   : > { %v1204_v28 = vadd.f32 %v1557_v26, %v2105_v40  ;;  %v1236_v29 = vadd.f32 %v1589_v27, %v2105_v40  ;;  %v829_v30 = vpop.f32.mrb[29].mxu0  ;;  %v957_v31 = vpop.f32.mrb[29].mxu1 }
 0x188   : > { %v1202_v32 = vadd.f32 %v2105_v40, %v829_v30  ;;  %v1234_v33 = vadd.f32 %v2105_v40, %v957_v31  ;;  %v1558_v34 = vpop.f32.mrb[30].mxu0  ;;  %v1590_v35 = vpop.f32.mrb[30].mxu1 }
 0x189   : > { %1268 = vst [vmem:[%s2111_s10 + $0xf0] sm:$0xff] %v1204_v28  ;;  %1300 = vst [vmem:[%s2111_s10 + $0x1f0] sm:$0xff] %v1236_v29  ;;  %v1205_v36 = vadd.f32 %v1558_v34, %v2105_v40  ;;  %v1237_v37 = vadd.f32 %v1590_v35, %v2105_v40  ;;  %v832_v38 = vpop.f32.mrb[31].mxu0  ;;  %v960_v39 = vpop.f32.mrb[31].mxu1 }
 0x18a   : > { %1266 = vst [vmem:[%s2111_s10 + $0xe0] sm:$0xff] %v1202_v32  ;;  %1298 = vst [vmem:[%s2111_s10 + $0x1e0] sm:$0xff] %v1234_v33  ;;  %v1203_v41 = vadd.f32 %v2105_v40, %v832_v38  ;;  %v1235_v42 = vadd.f32 %v2105_v40, %v960_v39 }
 0x18b   : > { %1269 = vst [vmem:[%s2111_s10 + $0xf8] sm:$0xff] %v1205_v36  ;;  %1301 = vst [vmem:[%s2111_s10 + $0x1f8] sm:$0xff] %v1237_v37 }
 0x18c   : > { %1267 = vst [vmem:[%s2111_s10 + $0xe8] sm:$0xff] %v1203_v41  ;;  %1299 = vst [vmem:[%s2111_s10 + $0x1e8] sm:$0xff] %v1235_v42 }
 0x18d   : > { %1795 = shalt.err (!%p1792_p5)
}
 0x18e   : > { %s1796_s29 = scalar_lea.hbm %s2234_s19, 8192  ;;  %s1800_s20 = scalar_lea.hbm %s2296_s3, 16384 }
 0x18f   : > { %p1797_p9 = scmp.ne.s32.totalorder %s2234_s19, %s1796_s29  ;;  %p1801_p3 = scmp.lt.u32.totalorder %s2234_s19, %s2296_s3 }
 0x190   : > { %p1802_p7 = scmp.lt.u32.totalorder %s1800_s20, %s1796_s29  ;;  %p1804_p4 = scmp.lt.u32.totalorder %s1796_s29, %s2234_s19 }
 0x191   : > { %p1798_p1 = pnand %p1797_p9, %p1996_p10 }
 0x192   : > { %p1803_p13 = por %p1802_p7, %p1801_p3 }
 0x193   : > { %p1799_p2 = pneg %p1798_p1 }
 0x194   : > { %p1805_p6 = por %p1804_p4, %p1803_p13 }
 0x196   : > { %p1806_p8 = pnand %p1805_p6, %p1799_p2 }
 0x198   : > { %1809 = shalt.err (!%p1806_p8)
}
 0x199   : > { %s1875_s10 = smov 128   ;;  %s1876_s11 = smov 8  }
 0x19a   : > { %1613 = dma.vmem_to_hbm [thread:$0]  (%p1996_p10), %s2236_s9, 8192, %s2234_s19, %s1303_s25, %s1875_s10, %s1875_s10, %s1876_s11  }
 0x19b PF: > { %s1331_s15 = sand.u32 1, %s1848_s12   ;;  %p2314_p12 = scmp.ne.s32.totalorder %s2304_s23, 0 }
 0x19c   : > { %p2315_p11 = scmp.ge.s32.totalorder %s1868_s17, 2  ;;  %s1332_s18 = scalar_lea.sflag [#allocation5], %s1331_s15 }
 0x19e   : > { %p1624_p0 = pnand %p2315_p11, %p2314_p12 }
 0x1a0   : > { %1843 = dma.done.wait (!%p1624_p0), %s1332_s18, 8192  }
 0x1a1   : > { %1845 = vsyncadd (!%p1624_p0), %s1332_s18, 4294959104  ;;  %s20_s17 = sadd.s32 1, %s1868_s17   ;;  %s2316_s12 = smov %s1852_s13 }
 0x1a2   : > { %p17_p5 = scmp.ge.s32.totalorder %s20_s17, 4   ;;  %s2317_s13 = smov %s1856_s14 }
 0x1a3   : > { %s2318_s14 = smov %s2005_s5  ;;  %s2319_s15 = smov %s1864_s16 }
 0x1a4   : > { %s2320_s16 = smov %s2322_s28  ;;  %19 = sbr.rel (!%p17_p5) target bundleno = 7 (0x7), region = 90 }
 0x1ab   :  { %1337 = vsyncpa [#allocation4], 1 }
 0x1ac   :  { %1339 = vsyncpa [#allocation4 + $0x1], 1 }
 0x1ad   :  { %1340 = vsyncpa [#allocation7], 1 }
 0x1ae   :  { %1341 = vsyncpa [#allocation5], 1 }
 0x1af   :  { %1343 = vsyncpa [#allocation5 + $0x1], 1 }

</bundles_post_ra>
